<compile_context>
chip_gen: v7x
topology: tpu7x:2x2x1
jax: 0.10.0
libtpu: 0.0.40
codegen_flags: <defaults>
</compile_context>

<pallas_src>
import functools

import jax
import jax.numpy as jnp
from jax.experimental import pallas as pl
from jax.experimental.pallas import tpu as pltpu


def _ce_sum_kernel(pre_ref, tgt_ref, out_ref, acc_ref, *, true_n):
    """Streams (tile_n, C) logits tiles, accumulating per-row cross entropy
    into a VMEM accumulator; emits the per-core partial sum on the last step."""
    core = pl.program_id(0)          # 'parallel' axis (megacore shard)
    i = pl.program_id(1)             # 'arbitrary' (reduction) axis over row tiles
    n_inner = pl.num_programs(1)

    @pl.when(i == 0)
    def _init():
        acc_ref[...] = jnp.zeros_like(acc_ref)

    x = pre_ref[...].astype(jnp.float32)                  # (tile_n, C), f32 math
    tn, c = x.shape

    # Numerically stable per-row logsumexp.
    m = jnp.max(x, axis=-1, keepdims=True)                # (tile_n, 1)
    lse = m + jnp.log(jnp.sum(jnp.exp(x - m), axis=-1, keepdims=True))

    # Gather the target-class logit via a one-hot mask (no dynamic gather on TPU).
    tgt = tgt_ref[...]                                    # (tile_n, 1) int32
    col = jax.lax.broadcasted_iota(jnp.int32, (tn, c), 1)
    x_t = jnp.sum(jnp.where(col == tgt, x, 0.0), axis=-1, keepdims=True)

    ce = lse - x_t                                        # (tile_n, 1)

    # Mask rows beyond the true N (boundary blocks contain garbage; the
    # where-select also discards any NaN/Inf produced in those rows).
    row0 = (core * n_inner + i) * tn
    rows = row0 + jax.lax.broadcasted_iota(jnp.int32, (tn, 1), 0)
    ce = jnp.where(rows < true_n, ce, 0.0)

    # Pure elementwise (VALU) accumulation every step; no per-step reduce.
    acc_ref[...] += ce

    @pl.when(i == n_inner - 1)
    def _finalize():
        out_ref[0, 0] = jnp.sum(acc_ref[...])


def _chip_config():
    """(vmem_limit_bytes, num_cores, pipelined_vmem_budget_bytes) per generation."""
    kind = ""
    try:
        kind = jax.devices()[0].device_kind.lower()
    except Exception:
        pass
    if "v7" in kind:
        # v7x: 64 MiB physical VMEM per TensorCore, 2 TCs per chip.
        return 48 * 1024 * 1024, 2, 24 * 1024 * 1024
    # v5e / v6e: 128 MiB physical VMEM, 1 TensorCore per chip.
    return 64 * 1024 * 1024, 1, 32 * 1024 * 1024


def _choose_tile_n(n, c, itemsize, num_cores, budget_bytes):
    """Largest row-tile whose lane-padded, double-buffered footprint fits budget."""
    c_pad = -(-c // 128) * 128
    # Per tile row:
    #   logits : 2 buffers x c_pad x itemsize
    #   targets: 2 buffers x 128 lanes x 4 B   (lane-padded int32 column)
    #   acc    : 1 x 128 lanes x 4 B           (lane-padded f32 column)
    per_row = 2 * c_pad * itemsize + 2 * 128 * 4 + 128 * 4
    t = max(1, budget_bytes // per_row)
    # Packed-sublane multiple: 8 for f32, 16 for bf16, 32 for int8/fp8.
    mult = max(8, 32 // max(itemsize, 1))
    per_core_rows = -(-n // num_cores)
    per_core_rows = -(-per_core_rows // mult) * mult
    t = min(t, per_core_rows)
    t = max(mult, (t // mult) * mult)
    return int(t)


def focal_loss(pre, target, gama=1.5, alpha=0.25):
    """pre: (N, C) float (f32 or bf16) logits; target: (N,) int class indices.

    Returns a scalar float32 loss identical to the PyTorch FocalLoss module.
    """
    n, c = pre.shape
    tgt = target.astype(jnp.int32).reshape(n, 1)

    vmem_limit, num_cores, budget = _chip_config()
    itemsize = jnp.dtype(pre.dtype).itemsize
    tile_n = _choose_tile_n(n, c, itemsize, num_cores, budget)
    n_blocks = pl.cdiv(n, tile_n)
    inner = pl.cdiv(n_blocks, num_cores)

    # Clamp the block index so the trailing core never issues a fully
    # out-of-bounds DMA (those steps are masked to zero in-kernel anyway).
    if num_cores * inner > n_blocks:
        idx_map = lambda cc, i: (jnp.minimum(cc * inner + i, n_blocks - 1), 0)
    else:
        idx_map = lambda cc, i: (cc * inner + i, 0)

    kernel = functools.partial(_ce_sum_kernel, true_n=n)

    partials = pl.pallas_call(
        kernel,
        out_shape=jax.ShapeDtypeStruct((num_cores, 1), jnp.float32),
        grid_spec=pltpu.PrefetchScalarGridSpec(
            num_scalar_prefetch=0,
            grid=(num_cores, inner),
            in_specs=[
                # Lane-dense logits tile; C is the full class dim (last axis -> lanes).
                pl.BlockSpec((tile_n, c), idx_map),
                pl.BlockSpec((tile_n, 1), idx_map),
            ],
            # Per-core partial CE sum lives on the scalar path.
            out_specs=pl.BlockSpec(
                (1, 1), lambda cc, i: (cc, 0),
                memory_space=pltpu.MemorySpace.SMEM),
            # VMEM vector accumulator (reduced only once, in the finalize step).
            scratch_shapes=[pltpu.VMEM((tile_n, 1), jnp.float32)],
        ),
        compiler_params=pltpu.CompilerParams(
            dimension_semantics=("parallel", "arbitrary"),
            vmem_limit_bytes=vmem_limit,
        ),
    )(pre, tgt)

    # Tiny scalar epilogue in the wrapper.
    ce_sum = jnp.sum(partials)
    logp = ce_sum / jnp.float32(n)          # CrossEntropyLoss(reduction='mean')
    p = jnp.exp(-logp)
    loss = (1.0 - p) ** gama * alpha * logp
    return loss


def _reference(pre, target, gama=1.5, alpha=0.25):
    # Pure-JAX reference replicating torch.nn.CrossEntropyLoss(reduction='mean').
    logits = pre.astype(jnp.float32)
    lse = jax.nn.logsumexp(logits, axis=-1)
    x_t = jnp.take_along_axis(logits, target[:, None].astype(jnp.int32), axis=-1)[:, 0]
    logp = jnp.mean(lse - x_t)
    p = jnp.exp(-logp)
    return (1.0 - p) ** gama * alpha * logp


if __name__ == "__main__":
    # FocalLoss has no learnable parameters (weight=None), so nothing to init.
    key = jax.random.PRNGKey(0)
    k1, k2 = jax.random.split(key)
    N, C = 8, 32                         # small (batch, num_classes)
    pre = jax.random.normal(k1, (N, C), dtype=jnp.float32)
    target = jax.random.randint(k2, (N,), 0, C, dtype=jnp.int32)

    out = focal_loss(pre, target)
    out = jax.block_until_ready(out)

    ref = _reference(pre, target)
    assert jnp.allclose(out, ref, rtol=1e-5, atol=1e-5), (out, ref)
    print("KERNEL_OK")
</pallas_src>

<mosaic_0001>
module attributes {stable_mosaic.version = 11 : i64} {
  func.func @_ce_sum_kernel(%arg0: i32, %arg1: i32, %arg2: memref<8x32xf32, #tpu.memory_space<vmem>>, %arg3: memref<8x1xi32, #tpu.memory_space<vmem>>, %arg4: memref<1x1xf32, #tpu.memory_space<smem>>, %arg5: memref<8x1xf32, #tpu.memory_space<vmem>>) attributes {dimension_semantics = [#tpu.dimension_semantics<parallel>, #tpu.dimension_semantics<arbitrary>], iteration_bounds = array<i64: 1, 1>, scalar_prefetch = 0 : i64, scratch_operands = 1 : i64, tpu.core_type = #tpu.core_type<tc>, window_params = [{transform_indices = @transform_0, window_bounds = array<i64: 8, 32>}, {transform_indices = @transform_1, window_bounds = array<i64: 8, 1>}, {transform_indices = @transform_2, window_bounds = array<i64: 1, 1>}]} {
    %c0_i32 = arith.constant 0 : i32
    %0 = arith.cmpi eq, %arg1, %c0_i32 : i32
    %1 = arith.extui %0 : i1 to i32
    %c0_i32_0 = arith.constant 0 : i32
    %2 = arith.cmpi ne, %1, %c0_i32_0 : i32
    scf.if %2 {
      %cst_15 = arith.constant 0.000000e+00 : f32
      %38 = vector.broadcast %cst_15 : f32 to vector<8x1xf32>
      %c0_16 = arith.constant 0 : index
      %c0_17 = arith.constant 0 : index
      %39 = vector.load %arg5[%c0_16, %c0_17] : memref<8x1xf32, #tpu.memory_space<vmem>>, vector<8x1xf32>
      tpu.vector_store %arg5[%c0_16, %c0_17], %38 {strides = array<i32>} : memref<8x1xf32, #tpu.memory_space<vmem>>, vector<8x1xf32>,
    } else {
    }
    %c0 = arith.constant 0 : index
    %c0_1 = arith.constant 0 : index
    %3 = vector.load %arg2[%c0, %c0_1] : memref<8x32xf32, #tpu.memory_space<vmem>>, vector<8x32xf32>
    %cst = arith.constant dense<0xFF800000> : vector<8xf32>
    %4 = vector.multi_reduction <maximumf>, %3, %cst [1] : vector<8x32xf32> to vector<8xf32>
    %5 = vector.shape_cast %4 : vector<8xf32> to vector<8x1xf32>
    %6 = vector.broadcast %5 : vector<8x1xf32> to vector<8x32xf32>
    %7 = arith.subf %3, %6 : vector<8x32xf32>
    %8 = math.exp %7 : vector<8x32xf32>
    %cst_2 = arith.constant dense<0.000000e+00> : vector<8xf32>
    %9 = vector.multi_reduction <add>, %8, %cst_2 [1] : vector<8x32xf32> to vector<8xf32>
    %10 = vector.shape_cast %9 : vector<8xf32> to vector<8x1xf32>
    %11 = math.log %10 : vector<8x1xf32>
    %12 = arith.addf %5, %11 : vector<8x1xf32>
    %c0_3 = arith.constant 0 : index
    %c0_4 = arith.constant 0 : index
    %13 = vector.load %arg3[%c0_3, %c0_4] : memref<8x1xi32, #tpu.memory_space<vmem>>, vector<8x1xi32>
    %14 = tpu.iota {dimensions = array<i32: 1>} : vector<8x32xi32>
    %15 = vector.broadcast %13 : vector<8x1xi32> to vector<8x32xi32>
    %16 = arith.cmpi eq, %14, %15 : vector<8x32xi32>
    %cst_5 = arith.constant 0.000000e+00 : f32
    %17 = vector.broadcast %cst_5 : f32 to vector<8x32xf32>
    %18 = arith.select %16, %3, %17 : vector<8x32xi1>, vector<8x32xf32>
    %cst_6 = arith.constant dense<0.000000e+00> : vector<8xf32>
    %19 = vector.multi_reduction <add>, %18, %cst_6 [1] : vector<8x32xf32> to vector<8xf32>
    %20 = vector.shape_cast %19 : vector<8xf32> to vector<8x1xf32>
    %21 = arith.subf %12, %20 : vector<8x1xf32>
    %c1_i32 = arith.constant 1 : i32
    %22 = arith.muli %arg0, %c1_i32 : i32
    %23 = arith.addi %22, %arg1 : i32
    %c8_i32 = arith.constant 8 : i32
    %24 = arith.muli %23, %c8_i32 : i32
    %25 = tpu.iota {dimensions = array<i32: 0>} : vector<8x1xi32>
    %26 = vector.broadcast %24 : i32 to vector<8x1xi32>
    %27 = arith.addi %26, %25 : vector<8x1xi32>
    %c8_i32_7 = arith.constant 8 : i32
    %28 = vector.broadcast %c8_i32_7 : i32 to vector<8x1xi32>
    %29 = arith.cmpi slt, %27, %28 : vector<8x1xi32>
    %cst_8 = arith.constant 0.000000e+00 : f32
    %30 = vector.broadcast %cst_8 : f32 to vector<8x1xf32>
    %31 = arith.select %29, %21, %30 : vector<8x1xi1>, vector<8x1xf32>
    %c0_9 = arith.constant 0 : index
    %c0_10 = arith.constant 0 : index
    %32 = vector.load %arg5[%c0_9, %c0_10] : memref<8x1xf32, #tpu.memory_space<vmem>>, vector<8x1xf32>
    %33 = arith.addf %32, %31 : vector<8x1xf32>
    %c0_11 = arith.constant 0 : index
    %c0_12 = arith.constant 0 : index
    %34 = vector.load %arg5[%c0_11, %c0_12] : memref<8x1xf32, #tpu.memory_space<vmem>>, vector<8x1xf32>
    tpu.vector_store %arg5[%c0_11, %c0_12], %33 {strides = array<i32>} : memref<8x1xf32, #tpu.memory_space<vmem>>, vector<8x1xf32>,
    %c0_i32_13 = arith.constant 0 : i32
    %35 = arith.cmpi eq, %arg1, %c0_i32_13 : i32
    %36 = arith.extui %35 : i1 to i32
    %c0_i32_14 = arith.constant 0 : i32
    %37 = arith.cmpi ne, %36, %c0_i32_14 : i32
    scf.if %37 {
      %c0_15 = arith.constant 0 : index
      %c0_16 = arith.constant 0 : index
      %38 = vector.load %arg5[%c0_15, %c0_16] : memref<8x1xf32, #tpu.memory_space<vmem>>, vector<8x1xf32>
      %39 = vector.shape_cast %38 : vector<8x1xf32> to vector<1x8x1xf32>
      %cst_17 = arith.constant dense<0.000000e+00> : vector<1xf32>
      %40 = vector.multi_reduction <add>, %39, %cst_17 [1, 2] : vector<1x8x1xf32> to vector<1xf32>
      %41 = vector.shape_cast %40 : vector<1xf32> to vector<1x1x1xf32>
      %42 = vector.extract %41[0, 0, 0] : f32 from vector<1x1x1xf32>
      %c0_18 = arith.constant 0 : index
      %c0_19 = arith.constant 0 : index
      %43 = memref.load %arg4[%c0_18, %c0_19] : memref<1x1xf32, #tpu.memory_space<smem>>
      memref.store %42, %arg4[%c0_18, %c0_19] : memref<1x1xf32, #tpu.memory_space<smem>>
    } else {
    }
    return
  }
  func.func @transform_0(%arg0: i32, %arg1: i32) -> (i32, i32) {
    %c1_i32 = arith.constant 1 : i32
    %0 = arith.muli %arg0, %c1_i32 : i32
    %1 = arith.addi %0, %arg1 : i32
    %c0_i32 = arith.constant 0 : i32
    %c0_i32_0 = arith.constant 0 : i32
    return %1, %c0_i32 : i32, i32
  }
  func.func @transform_1(%arg0: i32, %arg1: i32) -> (i32, i32) {
    %c1_i32 = arith.constant 1 : i32
    %0 = arith.muli %arg0, %c1_i32 : i32
    %1 = arith.addi %0, %arg1 : i32
    %c0_i32 = arith.constant 0 : i32
    %c0_i32_0 = arith.constant 0 : i32
    return %1, %c0_i32 : i32, i32
  }
  func.func @transform_2(%arg0: i32, %arg1: i32) -> (i32, i32) {
    %c0_i32 = arith.constant 0 : i32
    %c0_i32_0 = arith.constant 0 : i32
    return %arg0, %c0_i32 : i32, i32
  }
}

</mosaic_0001>

<bundles_post_ra>
// kernel: tpu_custom_call.1
= control target key start
LH: loop header
LB: loop body
LE: loop exit
PB: predicated region body
PF: predicated region fallthrough
CT: control target
= control target key end

     0   :  { %7 = vsyncpa [#allocation4], 0  ;;  %s250_s0 = inlined_call_operand.hbm [shape: f32[8,32], index: 0, kind: input, shape index: {}]   ;;  %s251_s1 = inlined_call_operand.hbm [shape: s32[8,1], index: 1, kind: input, shape index: {}]   ;;  %s252_s2 = inlined_call_operand.hbm [shape: f32[1,1], index: 2, kind: output, shape index: {}]  }
   0x1   :  { %8 = vsyncpa [#allocation7], 0 }
   0x2   :  { %9 = vsyncpa [#allocation5], 0  ;;  %s191_s9 = smov [#allocation3]   ;;  %s192_s11 = smov [#allocation6]  }
   0x3   :  { %s19_s10 = sshll.u32 %s191_s9, 4  ;;  %s32_s12 = sshll.u32 %s192_s11, 4  ;;  %s20_s10 = int_to_ptr.vmem [resolvable:$true] %s19_s10  ;;  %s33_s12 = int_to_ptr.vmem [resolvable:$true] %s32_s12 }
   0x4   :  { %s131_s15 = scalar_lea.hbm %s250_s0, 128 }
   0x5   :  { %p132_p0 = scmp.ne.s32.totalorder %s250_s0, %s131_s15  ;;  %p135_p1 = scmp.lt.u32.totalorder %s131_s15, %s250_s0 }
   0x7   :  { %p137_p2 = pnand %p135_p1, %p132_p0 }
   0x9   :  { %140 = shalt.err (!%p137_p2)
}
   0xa   :  { %s141_s20 = scalar_lea.vmem %s20_s10, 128  ;;  %p146_p4 = scmp.lt.s32.totalorder %s20_s10, %s20_s10 }
   0xb   :  { %p142_p3 = scmp.ne.s32.totalorder %s20_s10, %s141_s20  ;;  %p147_p5 = scmp.lt.s32.totalorder %s141_s20, %s141_s20 }
   0xd   :  { %p148_p6 = por %p147_p5, %p146_p4 }
   0xf   :  { %p149_p7 = pnand %p148_p6, %p142_p3 }
  0x11   :  { %152 = shalt.err (!%p149_p7)
}
  0x12   :  { %22 = dma.hbm_to_vmem [thread:$0]  %s250_s0, 128, %s20_s10, [#allocation4]  }
  0x13   :  { %s153_s25 = scalar_lea.hbm %s251_s1, 128 }
  0x14   :  { %p154_p8 = scmp.ne.s32.totalorder %s251_s1, %s153_s25  ;;  %p157_p9 = scmp.lt.u32.totalorder %s153_s25, %s251_s1 }
  0x16   :  { %p159_p10 = pnand %p157_p9, %p154_p8 }
  0x18   :  { %162 = shalt.err (!%p159_p10)
}
  0x19   :  { %s163_s30 = scalar_lea.vmem %s33_s12, 128  ;;  %p168_p12 = scmp.lt.s32.totalorder %s33_s12, %s33_s12 }
  0x1a   :  { %p164_p11 = scmp.ne.s32.totalorder %s33_s12, %s163_s30  ;;  %p169_p13 = scmp.lt.s32.totalorder %s163_s30, %s163_s30 }
  0x1c   :  { %p170_p0 = por %p169_p13, %p168_p12 }
  0x1e   :  { %p171_p1 = pnand %p170_p0, %p164_p11 }
  0x20   :  { %174 = shalt.err (!%p171_p1)
}
  0x21   :  { %35 = dma.hbm_to_vmem [thread:$0]  %s251_s1, 128, %s33_s12, [#allocation7]  }
  0x22   :  { %185 = dma.done.wait [#allocation4], 128  }
  0x23   :  { %186 = vsyncadd [#allocation4], 4294967168 }
  0x24   :  { %187 = dma.done.wait [#allocation7], 128  }
  0x25   :  { %188 = vsyncadd [#allocation7], 4294967168  ;;  %v193_v0 = vmov 0   ;;  %vm51_vm0 = vcmask 261120   ;;  %v50_v1 = vld [vmem:[#allocation3] sm:$0xff]  ;;  %v64_v3 = vld [vmem:[#allocation6] sm:$0xff]  ;;  %v65_v7 = vlaneseq }
  0x26   :  { %126 = vset.pattern.permute.xlu0 %v193_v0  ;;  %v52_v2 = vsel %vm51_vm0, %v50_v1, -inf  ;;  %vm48_vm2 = vcmask 7168   ;;  %v194_v14 = vmov 0.0   ;;  %s175_s6 = scalar_lea.hbm %s252_s2, 16 }
  0x27   :  { %53 = vmax.xlane.f32.xlu0 %v52_v2  ;;  %v66_v8 = vand.u32 127, %v65_v7  ;;  %49 = vst.msk [vmem:[#allocation2] sm:$0xff] %vm48_vm2, %v194_v14  ;;  %p176_p2 = scmp.ne.s32.totalorder %s252_s2, %s175_s6  ;;  %p179_p3 = scmp.lt.u32.totalorder %s175_s6, %s252_s2 }
  0x29   :  { %p181_p4 = pnand %p179_p3, %p176_p2 }
  0x2e   :  { %v84_v20 = vld [vmem:[#allocation2] sm:$0xff] }
  0x3d   :  { %68 = vperm.xlu0 %126, %v64_v3  }
  0xb4   :  { %v54_v4 = vpop.xlane.xlu0 %53 }
  0xb5   :  { %v55_v5 = vsub.f32 %v50_v1, %v54_v4 }
  0xb7   :  { %v56_v6 = vmul.f32 1.442695, %v55_v5 }
  0xb9   :  { %127 = vpow2.f32 %v56_v6 }
  0xbc   :  { %v69_v9 = vpop.permute.xlu0 %68 }
  0xbd   :  { %vm70_vm1 = vcmp.eq.s32.totalorder %v66_v8, %v69_v9 }
  0xbe   :  { %v71_v11 = vsel %vm70_vm1, %v50_v1, 0.0 }
  0xbf   :  { %v72_v13 = vsel %vm51_vm0, %v71_v11, 0.0 }
  0xc3   :  { %v128_v10 = vpop.eup %127 }
  0xc4   :  { %v58_v12 = vsel %vm51_vm0, %v128_v10, 0.0 }
  0xc5   :  { %59 = vadd.xlane.f32.xlu1 %v58_v12 }
  0xc9   :  { %73 = vadd.xlane.f32.xlu1 %v72_v13 }
 0x152   :  { %v60_v15 = vpop.xlane.xlu1 %59 }
 0x153   :  { %129 = vlog2.f32 %v60_v15 }
 0x156   :  { %v74_v18 = vpop.xlane.xlu1 %73 }
 0x15d   :  { %v130_v16 = vpop.eup %129 }
 0x15e   :  { %v62_v17 = vmul.f32 0.6931472, %v130_v16 }
 0x160   :  { %v63_v19 = vadd.f32 %v62_v17, %v54_v4 }
 0x162   :  { %v75_v21 = vsub.f32 %v63_v19, %v74_v18 }
 0x164   :  { %v85_v22 = vadd.f32 %v84_v20, %v75_v21 }
 0x166   :  { %87 = vst.msk [vmem:[#allocation2] sm:$0xff] %vm48_vm2, %v85_v22 }
 0x16d   :  { %v91_v23 = vld [vmem:[#allocation2] sm:$0xff] }
 0x16e   :  { %v92_v24 = vsel %vm48_vm2, %v91_v23, 0.0 }
 0x16f   :  { %93 = vadd.xlane.f32.xlu1 %v92_v24 }
 0x1fc   :  { %v94_v25 = vpop.xlane.xlu1 %93 }
 0x1fd   :  { %v95_v26 = vrot.slane %v94_v25, 4 }
 0x1ff   :  { %v96_v27 = vadd.f32 %v95_v26, %v94_v25 }
 0x201   :  { %v97_v28 = vrot.slane %v96_v27, 2 }
 0x203   :  { %v98_v29 = vadd.f32 %v97_v28, %v96_v27 }
 0x205   :  { %v99_v30 = vrot.slane %v98_v29, 1 }
 0x207   :  { %v100_v31 = vadd.f32 %v99_v30, %v98_v29 }
 0x209   :  { %119 = vpush %v100_v31 }
 0x23a   :  { %s120_s1 = spop %119 }
 0x23b   :  { %103 = sst [smem:[#allocation8]] %s120_s1 }
 0x23c   :  { %184 = shalt.err (!%p181_p4)
}
 0x23d   :  { %s195_s11 = smov [#allocation8]  }
 0x23e   :  { %111 = dma.smem_to_hbm %s195_s11, 16, %s252_s2, [#allocation5]  }
 0x23f   :  { %189 = dma.done.wait [#allocation5], 16  }
 0x240   :  { %190 = vsyncadd [#allocation5], 4294967280 }
 0x241   :  { %115 = sfence }
 0x242   :  { %116 = vsyncpa [#allocation4], 1 }
 0x243   :  { %117 = vsyncpa [#allocation7], 1 }
 0x244   :  { %118 = vsyncpa [#allocation5], 1 }

</bundles_post_ra>
